<compile_context>
chip_gen: v7x
topology: tpu7x:2x2x1
jax: 0.10.0
libtpu: 0.0.40
codegen_flags: <defaults>
</compile_context>

<pallas_src>
from functools import partial

import numpy as np
import jax
import jax.numpy as jnp
from jax import lax
from jax.experimental import pallas as pl
from jax.experimental.pallas import tpu as pltpu


# ----------------------------------------------------------------------------
# Synthetic "SumRep": 8 scalar channels (self-gated) followed by 4 gated irreps
# of dimension 6, each sharing one gate scalar appended at the tail.
# rep_size = 8 + 4*6 = 32, num_gates = 4, n_total = 36.
# ----------------------------------------------------------------------------
NUM_SCALARS = 8
NUM_GATES = 4
IRREP_DIM = 6
REP_SIZE = NUM_SCALARS + NUM_GATES * IRREP_DIM      # 32
N_TOTAL = REP_SIZE + NUM_GATES                      # 36

_CHUNK_ROWS = 1024   # in-kernel row-chunk size (bounds temporaries / live ranges)


def make_gate_indices():
    """gate_indices(rep) for the synthetic SumRep above (static, host side)."""
    scalar_part = np.arange(NUM_SCALARS)                                  # scalars gate themselves
    gated_part = np.repeat(REP_SIZE + np.arange(NUM_GATES), IRREP_DIM)    # shared gate scalars
    return np.concatenate([scalar_part, gated_part]).astype(np.int32)     # (REP_SIZE,)


def make_selection_matrix():
    """0/1 matrix S (N_TOTAL, REP_SIZE): S[i, j] = 1 iff gate_indices[j] == i,
    so v @ S == v[:, gate_indices] exactly (one 1 per column, exact in bf16)."""
    gidx = make_gate_indices()
    sel = np.zeros((N_TOTAL, REP_SIZE), dtype=np.float32)
    sel[gidx, np.arange(REP_SIZE)] = 1.0
    return sel


# ----------------------------------------------------------------------------
# Kernel: per row-chunk, bf16 0/1-matmul gather of the gate scalars + sigmoid*value.
# ----------------------------------------------------------------------------
def gated_nonlin_kernel(v_ref, sel_ref, o_ref, *, rep_size, num_scalars, chunk_rows):
    block_rows = v_ref.shape[0]
    n_chunks = block_rows // chunk_rows      # wrapper guarantees exact division
    sel = sel_ref[...]                       # (n_total, rep_size) bf16, hoisted

    def body(c, carry):
        r0 = pl.multiple_of(c * chunk_rows, chunk_rows)
        v = v_ref[pl.ds(r0, chunk_rows), :]                      # (chunk, n_total)
        vals = v[:, :rep_size].astype(jnp.float32)               # (chunk, rep_size), exact
        # Single-pass bf16 MXU gather: gate[:, j] == bf16(v[:, gate_indices[j]]) exactly.
        gate = jnp.dot(v.astype(jnp.bfloat16), sel,
                       preferred_element_type=jnp.float32)       # (chunk, rep_size)
        # Self-gated scalar channels stay bit-exact f32.
        lane = lax.broadcasted_iota(jnp.int32, (chunk_rows, rep_size), 1)
        gate = jnp.where(lane < num_scalars, vals, gate)
        # sigmoid written explicitly (exp -> EUP); numerically safe for any finite gate.
        sig = 1.0 / (1.0 + jnp.exp(-gate))
        o_ref[pl.ds(r0, chunk_rows), :] = (sig * vals).astype(o_ref.dtype)
        return carry

    lax.fori_loop(0, n_chunks, body, 0, unroll=True)


def _round_up(n, m):
    return ((n + m - 1) // m) * m


def gated_nonlinearity(values, *, bm=8192):
    """values: (..., N_TOTAL) -> (..., REP_SIZE), channels last."""
    lead = values.shape[:-1]
    n_total = values.shape[-1]
    assert n_total == N_TOTAL, (n_total, N_TOTAL)
    v2 = values.reshape(-1, n_total)
    n_rows = v2.shape[0]

    # Sublane tile of the second-minor axis depends on dtype packing
    # (f32: 8 rows, bf16: 16, int8/fp8: 32).
    itemsize = jnp.dtype(values.dtype).itemsize
    row_align = max(8, 8 * (4 // itemsize))

    # Row-tile selection:
    #  * default bm=8192 amortises the ~0.35us per-grid-step overhead while the
    #    double-buffered VMEM footprint stays ~16 MiB;
    #  * keep >= 2 grid steps when possible so both v7x TensorCores get work;
    #  * round blocks larger than the in-kernel chunk to a chunk multiple so the
    #    inner fori_loop tiles them exactly (ragged last *grid* block is handled by
    #    Pallas masked writeback, no wrapper pad/trim).
    target = bm
    if n_rows > row_align:
        target = min(target, _round_up(pl.cdiv(n_rows, 2), row_align))
    bm_eff = max(row_align, min(target, _round_up(n_rows, row_align)))
    if bm_eff > _CHUNK_ROWS:
        bm_eff = _round_up(bm_eff, _CHUNK_ROWS)
    chunk_rows = min(_CHUNK_ROWS, bm_eff)
    grid = (pl.cdiv(n_rows, bm_eff),)

    sel = jnp.asarray(make_selection_matrix(), dtype=jnp.bfloat16)   # (36, 32)

    kernel = partial(
        gated_nonlin_kernel,
        rep_size=REP_SIZE,
        num_scalars=NUM_SCALARS,
        chunk_rows=chunk_rows,
    )

    out = pl.pallas_call(
        kernel,
        out_shape=jax.ShapeDtypeStruct((n_rows, REP_SIZE), values.dtype),
        grid_spec=pltpu.PrefetchScalarGridSpec(
            num_scalar_prefetch=0,
            grid=grid,
            in_specs=[
                pl.BlockSpec((bm_eff, n_total), lambda i: (i, 0)),
                # Constant index_map: fetched once, kept resident across grid steps.
                pl.BlockSpec((N_TOTAL, REP_SIZE), lambda i: (0, 0)),
            ],
            out_specs=pl.BlockSpec((bm_eff, REP_SIZE), lambda i: (i, 0)),
        ),
        compiler_params=pltpu.CompilerParams(
            dimension_semantics=("parallel",),
            # Explicit scoped-VMEM budget (v5e default is only 16 MiB): ~16 MiB of
            # double-buffered blocks + ~2-3 MiB of chunked temporaries at bm=8192.
            vmem_limit_bytes=32 * 1024 * 1024,
        ),
    )(v2, sel)

    return out.reshape(*lead, REP_SIZE)


if __name__ == "__main__":
    gate_idx = make_gate_indices()

    def reference_exact(vals):
        return jax.nn.sigmoid(vals[..., gate_idx]) * vals[..., :REP_SIZE]

    def reference_bf16_gate(vals):
        # What the kernel computes exactly: gated channels use bf16-rounded gate
        # scalars (single-pass MXU gather); self-gated scalar channels stay f32.
        g = vals[..., gate_idx]
        ch = np.arange(REP_SIZE)
        g = jnp.where(ch < NUM_SCALARS, g, g.astype(jnp.bfloat16).astype(vals.dtype))
        return jax.nn.sigmoid(g) * vals[..., :REP_SIZE]

    # Small example consistent with the module: batch=2, seq=8, channels=36.
    key = jax.random.PRNGKey(0)
    values = jax.random.normal(key, (2, 8, N_TOTAL), dtype=jnp.float32)
    out = jax.block_until_ready(gated_nonlinearity(values))
    assert out.shape == (2, 8, REP_SIZE)
    np.testing.assert_allclose(np.asarray(out), np.asarray(reference_bf16_gate(values)),
                               rtol=1e-5, atol=1e-5)
    np.testing.assert_allclose(np.asarray(out), np.asarray(reference_exact(values)),
                               rtol=1e-2, atol=1e-3)

    # Ragged / multi-step grid check: 4000 rows -> 2 blocks of 2048 (last one masked).
    values2 = jax.random.normal(jax.random.PRNGKey(1), (4, 1000, N_TOTAL), dtype=jnp.float32)
    out2 = jax.block_until_ready(gated_nonlinearity(values2))
    np.testing.assert_allclose(np.asarray(out2), np.asarray(reference_bf16_gate(values2)),
                               rtol=1e-5, atol=1e-5)
    np.testing.assert_allclose(np.asarray(out2), np.asarray(reference_exact(values2)),
                               rtol=1e-2, atol=1e-3)

    print("KERNEL_OK")
</pallas_src>

<mosaic_0001>
module attributes {stable_mosaic.version = 11 : i64} {
  func.func @gated_nonlin_kernel(%arg0: i32, %arg1: memref<8x36xf32, #tpu.memory_space<vmem>>, %arg2: memref<36x32xbf16, #tpu.memory_space<vmem>>, %arg3: memref<8x32xf32, #tpu.memory_space<vmem>>) attributes {dimension_semantics = [#tpu.dimension_semantics<parallel>], iteration_bounds = array<i64: 2>, scalar_prefetch = 0 : i64, scratch_operands = 0 : i64, tpu.core_type = #tpu.core_type<tc>, window_params = [{transform_indices = @transform_0, window_bounds = array<i64: 8, 36>}, {pipeline_mode = #tpu.pipeline_mode<synchronous>, transform_indices = @transform_1, window_bounds = array<i64: 36, 32>}, {transform_indices = @transform_2, window_bounds = array<i64: 8, 32>}]} {
    %c0 = arith.constant 0 : index
    %c0_0 = arith.constant 0 : index
    %0 = vector.load %arg2[%c0, %c0_0] : memref<36x32xbf16, #tpu.memory_space<vmem>>, vector<36x32xbf16>
    %c0_i32 = arith.constant 0 : i32
    %c8_i32 = arith.constant 8 : i32
    %1 = arith.muli %c0_i32, %c8_i32 : i32
    %2 = tpu.assume_multiple %1, 8 : i32
    %3 = arith.index_cast %2 : i32 to index
    %c0_1 = arith.constant 0 : index
    %4 = vector.load %arg1[%3, %c0_1] : memref<8x36xf32, #tpu.memory_space<vmem>>, vector<8x36xf32>
    %5 = vector.extract_strided_slice %4 {offsets = [0, 0], sizes = [8, 32], strides = [1, 1]} : vector<8x36xf32> to vector<8x32xf32>
    %6 = arith.truncf %4 : vector<8x36xf32> to vector<8x36xbf16>
    %cst = arith.constant dense<0.000000e+00> : vector<8x32xf32>
    %7 = tpu.matmul %6, %0, %cst {dimension_numbers = #tpu.dot_dimension_numbers<[1], [0], [0], [1], [0, 0, 1, 1], [], []>} : vector<8x36xbf16>, vector<36x32xbf16>, vector<8x32xf32> -> vector<8x32xf32>
    %8 = tpu.iota {dimensions = array<i32: 1>} : vector<8x32xi32>
    %c8_i32_2 = arith.constant 8 : i32
    %9 = vector.broadcast %c8_i32_2 : i32 to vector<8x32xi32>
    %10 = arith.cmpi slt, %8, %9 : vector<8x32xi32>
    %11 = arith.select %10, %5, %7 : vector<8x32xi1>, vector<8x32xf32>
    %cst_3 = arith.constant 0.000000e+00 : f32
    %12 = vector.broadcast %cst_3 : f32 to vector<8x32xf32>
    %13 = arith.subf %12, %11 : vector<8x32xf32>
    %14 = math.exp %13 : vector<8x32xf32>
    %cst_4 = arith.constant 1.000000e+00 : f32
    %15 = vector.broadcast %cst_4 : f32 to vector<8x32xf32>
    %16 = arith.addf %15, %14 : vector<8x32xf32>
    %cst_5 = arith.constant 1.000000e+00 : f32
    %17 = vector.broadcast %cst_5 : f32 to vector<8x32xf32>
    %18 = arith.divf %17, %16 : vector<8x32xf32>
    %19 = arith.mulf %18, %5 : vector<8x32xf32>
    %20 = arith.index_cast %2 : i32 to index
    %c0_6 = arith.constant 0 : index
    %21 = vector.load %arg3[%20, %c0_6] : memref<8x32xf32, #tpu.memory_space<vmem>>, vector<8x32xf32>
    tpu.vector_store %arg3[%20, %c0_6], %19 {strides = array<i32>} : memref<8x32xf32, #tpu.memory_space<vmem>>, vector<8x32xf32>,
    %c1_i32 = arith.constant 1 : i32
    return
  }
  func.func @transform_0(%arg0: i32) -> (i32, i32) {
    %c0_i32 = arith.constant 0 : i32
    %c0_i32_0 = arith.constant 0 : i32
    return %arg0, %c0_i32 : i32, i32
  }
  func.func @transform_1(%arg0: i32) -> (i32, i32) {
    %c0_i32 = arith.constant 0 : i32
    %c0_i32_0 = arith.constant 0 : i32
    %c0_i32_1 = arith.constant 0 : i32
    return %c0_i32, %c0_i32_0 : i32, i32
  }
  func.func @transform_2(%arg0: i32) -> (i32, i32) {
    %c0_i32 = arith.constant 0 : i32
    %c0_i32_0 = arith.constant 0 : i32
    return %arg0, %c0_i32 : i32, i32
  }
}

</mosaic_0001>

<bundles_post_ra>
// kernel: tpu_custom_call.1
= control target key start
LH: loop header
LB: loop body
LE: loop exit
PB: predicated region body
PF: predicated region fallthrough
CT: control target
= control target key end

     0   :  { %7 = vsyncpa [#allocation3], 0  ;;  %s563_s0 = inlined_call_operand.vmem [shape: f32[16,36], index: 0, kind: input, shape index: {}]   ;;  %s564_s1 = inlined_call_operand.vmem [shape: bf16[36,32], index: 1, kind: input, shape index: {}]   ;;  %s565_s2 = inlined_call_operand.hbm [shape: f32[16,32], index: 2, kind: output, shape index: {}]  }
   0x1   :  { %9 = vsyncpa [#allocation3 + $0x1], 0  ;;  %s454_s9 = smov 0   ;;  %s456_s10 = smov 0  }
   0x2   :  { %s458_s11 = smov 0   ;;  %s460_s12 = smov 0  }
   0x3 LB: > { %s475_s13 = sadd.s32 4294967295, %s434_s12   ;;  %s296_s14 = sadd.s32 4294967294, %s434_s12   ;;  %s434_s12 = sphi %s460_s12, %s571_s12   ;;  %s430_s11 = sphi %s458_s11, %s570_s11   ;;  %s426_s10 = sphi %s456_s10, %s569_s10   ;;  %s422_s9 = sphi %s454_s9, %s568_s9  }
   0x4   : > { %s479_s15 = sadd.s32 1, %s434_s12   ;;  %s69_s16 = sadd.s32 1, %s430_s11 }
   0x5   : > { %s66_s17 = ssub.s32 %s434_s12, %s479_s15  ;;  %p79_p0 = scmp.ne.s32.totalorder %s430_s11, %s426_s10 }
   0x6   : > { %p67_p1 = scmp.eq.s32.totalorder %s66_s17, 0  ;;  %p80_p2 = scmp.eq.s32.totalorder %s475_s13, 1 }
   0x7   : > { %p85_p3 = scmp.ne.s32.totalorder %s426_s10, %s422_s9  ;;  %p86_p4 = scmp.eq.s32.totalorder %s296_s14, 1 }
   0x8   : > { %s490_s18 = scalar_select %p67_p1, %s430_s11, %s69_s16  }
   0x9   : > { %p492_p5 = por %p80_p2, %p79_p0  ;;  %p496_p6 = por %p86_p4, %p85_p3 }
   0xa   : > { %p299_p7 = scmp.ge.s32.totalorder %s434_s12, 1  ;;  %p114_p8 = scmp.lt.s32.totalorder %s434_s12, 3 }
   0xc   : > { %p115_p9 = pnand %p299_p7, %p114_p8 }
   0xd   : > { %v365_v0 = vld [vmem:[%s564_s1] sm:$0xff] (!%p115_p9)   ;;  %v436_v1 = vmov (!%p115_p9), 0.0   ;;  %v366_v2 = vld [vmem:[%s564_s1 + $0x8] sm:$0xff] (!%p115_p9)   ;;  %v367_v3 = vld [vmem:[%s564_s1 + $0x10] ss:$0 sps:$4 sm:$0x33] (!%p115_p9)   ;;  %v210_v7 = vlaneseq (!%p115_p9) }
   0xe   : > { %118 = sbr.rel (%p115_p9) target bundleno = 285 (0x11d), region = 28  ;;  %314 = vmatprep.subr.bf16.mxu0 (!%p115_p9), %v436_v1  ;;  %vm437_vm0 = vmmov (!%p115_p9), 0   ;;  %p135_p10 = scmp.lt.s32.totalorder (!%p115_p9), %s475_s13, 1  ;;  %vm166_vm1 = vcmask (!%p115_p9), 1041408   ;;  %vm162_vm2 = vcmask (!%p115_p9), 293888   ;;  %vm221_vm4 = vcmask (!%p115_p9), 261120  }
   0xf   : > { %315 = vmatpush3.bf16.msra.mxu0 (!%p115_p9), %v365_v0  ;;  %320 = vmatprep.mubr.msk.bf16.mxu0 (!%p115_p9), %vm437_vm0, %v436_v1  ;;  %v168_v4 = vsel (!%p115_p9), %vm166_vm1, %v367_v3, 0  ;;  %v211_v8 = vand.u32 (!%p115_p9), 127, %v210_v7  ;;  %s132_s4 = sand.u32 (!%p115_p9), 1, %s426_s10   ;;  %s307_s6 = sshll.u32 (!%p115_p9), %s475_s13, 7 }
  0x10   : > { %316 = vmatprep.subr.bf16.mxu0 (!%p115_p9), %v436_v1  ;;  %s300_s5 = sshll.u32 (!%p115_p9), %s132_s4, 3  ;;  %s521_s17 = scalar_lea.hbm (!%p115_p9), %s565_s2, %s307_s6 }
  0x11   : > { %vm212_vm3 = vcmp.lt.s32.totalorder (!%p115_p9), %v211_v8, 8  ;;  %s134_s7 = scalar_lea.vmem (!%p115_p9), [#allocation2], %s300_s5  ;;  %s224_s21 = scalar_lea.sflag (!%p115_p9), [#allocation3], %s132_s4 }
  0x12   : > { %s237_s8 = sshll.u32 (!%p115_p9), %s134_s7, 4  ;;  %s523_s8 = int_to_ptr.vmem [resolvable:$true] %s237_s8 }
  0x13   : > { %317 = vmatpush3.bf16.msra.mxu0 (!%p115_p9), %v366_v2  ;;  %s372_s22 = scalar_lea.vmem (!%p115_p9), %s523_s8, 128 }
  0x14   : > { %318 = vmatprep.subr.bf16.mxu0 (!%p115_p9), %v436_v1  ;;  %p373_p11 = scmp.ne.s32.totalorder (!%p115_p9), %s523_s8, %s372_s22 }
  0x15   : > { %s136_s27 = scalar_select %p135_p10, %s475_s13, 1 }
  0x16   : > { %p374_p12 = pnand %p373_p11, %p492_p5  ;;  %s438_s13 = smov [#allocation2]  }
  0x17   : > { %s301_s28 = sshll.u32 %s136_s27, 3  ;;  %319 = vmatpush3.bf16.msra.mxu0 %v168_v4  ;;  %s376_s23 = sshll.u32 %s438_s13, 4  ;;  %s377_s23 = int_to_ptr.vmem [resolvable:$false] %s376_s23 }
  0x18   : > { %s138_s3 = scalar_lea.vmem %s563_s0, %s301_s28  ;;  %p375_p13 = pneg %p374_p12 }
  0x19   : > { %v145_v5 = vld [vmem:[%s138_s3] sm:$0xff]  ;;  %s378_s24 = scalar_lea.vmem %s377_s23, 256  ;;  %p379_p0 = scmp.lt.s32.totalorder %s523_s8, %s377_s23 }
  0x1a   : > { %v146_v6 = vpack.c.bf16 %v145_v5, %v145_v5  ;;  %p380_p1 = scmp.lt.s32.totalorder %s378_s24, %s372_s22 }
  0x1c   : > { %321 = vmatmul.mubr.msk.bf16.vlgmr.msra.gmra.mrb[0].mxu0 %vm162_vm2, %v146_v6  ;;  %p381_p2 = por %p380_p1, %p379_p0 }
  0x1e   : > { %p382_p3 = pnand %p381_p2, %p375_p13 }
  0xef   : > { %v204_v9 = vpop.f32.mrb[0].mxu0 }
  0xf0   : > { %v213_v10 = vsel %vm212_vm3, %v145_v5, %v204_v9  ;;  %v322_v11 = vpop.f32.mrb[1].mxu0 }
  0xf1   : > { %v214_v12 = vsub.f32 0.0, %v213_v10  ;;  %v207_v13 = vpop.f32.mrb[2].mxu0 }
  0xf2   : > { %v323_v14 = vpop.f32.mrb[3].mxu0 }
  0xf3   : > { %v215_v15 = vmul.f32 1.442695, %v214_v12 }
  0xf5   : > { %368 = vpow2.f32 %v215_v15 }
  0xff   : > { %v369_v16 = vpop.eup %368 }
 0x100   : > { %v217_v17 = vadd.f32 1.0, %v369_v16 }
 0x102   : > { %370 = vrcp.f32 %v217_v17 }
 0x10c   : > { %v371_v18 = vpop.eup %370 }
 0x10d   : > { %v220_v19 = vmul.f32 %v371_v18, %v145_v5 }
 0x10f   : > { %222 = vst.msk [vmem:[%s134_s7] sm:$0xff] %vm221_vm4, %v220_v19 }
 0x110   : > { %385 = shalt.err (!%p382_p3)
}
 0x111   : > { %s386_s25 = scalar_lea.hbm %s521_s17, 128  ;;  %s390_s28 = scalar_lea.hbm %s565_s2, 256 }
 0x112   : > { %p387_p4 = scmp.ne.s32.totalorder %s521_s17, %s386_s25  ;;  %p391_p9 = scmp.lt.u32.totalorder %s521_s17, %s565_s2 }
 0x113   : > { %p392_p10 = scmp.lt.u32.totalorder %s390_s28, %s386_s25  ;;  %p394_p12 = scmp.lt.u32.totalorder %s386_s25, %s521_s17 }
 0x114   : > { %p388_p7 = pnand %p387_p4, %p492_p5 }
 0x115   : > { %p393_p11 = por %p392_p10, %p391_p9 }
 0x116   : > { %p389_p8 = pneg %p388_p7 }
 0x117   : > { %p395_p13 = por %p394_p12, %p393_p11 }
 0x119   : > { %p396_p0 = pnand %p395_p13, %p389_p8 }
 0x11b   : > { %399 = shalt.err (!%p396_p0)
}
 0x11c   : > { %324 = dma.vmem_to_hbm [thread:$0]  (%p492_p5), %s523_s8, 128, %s521_s17, %s224_s21  }
 0x11d PF: > { %p330_p1 = scmp.ge.s32.totalorder %s434_s12, 2  ;;  %s249_s3 = sand.u32 1, %s422_s9  }
 0x11e   : > { %s250_s4 = scalar_lea.sflag [#allocation3], %s249_s3 }
 0x11f   : > { %p327_p2 = pnand %p330_p1, %p496_p6 }
 0x121   : > { %417 = dma.done.wait (!%p327_p2), %s250_s4, 128  }
 0x122   : > { %419 = vsyncadd (!%p327_p2), %s250_s4, 4294967168  ;;  %p12_p3 = scmp.ge.s32.totalorder %s479_s15, 4   ;;  %s568_s9 = smov %s426_s10 }
 0x123   : > { %s569_s10 = smov %s430_s11  ;;  %s570_s11 = smov %s490_s18 }
 0x124   : > { %s571_s12 = smov %s479_s15  ;;  %14 = sbr.rel (!%p12_p3) target bundleno = 3 (0x3), region = 63 }
 0x12b   :  { %255 = vsyncpa [#allocation3], 1 }
 0x12c   :  { %257 = vsyncpa [#allocation3 + $0x1], 1 }

</bundles_post_ra>
